<compile_context>
chip_gen: v5e
topology: v5e:2x2
jax: 0.10.0
libtpu: 0.0.40
codegen_flags: <defaults>
</compile_context>

<pallas_src>
import jax
import jax.numpy as jnp
from jax import lax
from jax.experimental import pallas as pl
from jax.experimental.pallas import tpu as pltpu


def sensitive_classifier_kernel(x_ref, w1_ref, wh_ref, out_ref):
    # x_ref  : (tm, D_in)  batch tile
    # w1_ref : (H, D_in)   fc1 weight, PyTorch (out, in) layout
    # wh_ref : (2*O, H)    fc_race / fc_sex weights stacked on the out axis
    # out_ref: (2*O, tm)   transposed, lane-dense fused output
    x = x_ref[...]
    w1 = w1_ref[...]
    wh = wh_ref[...]

    # Contract on in_features directly (dim 1 of both operands): the MXU consumes
    # the PyTorch (out, in) layout with zero data movement / no transposes.
    dn = (((1,), (1,)), ((), ()))
    h = lax.dot_general(x, w1, dimension_numbers=dn,
                        preferred_element_type=jnp.float32)
    h = jnp.maximum(h, 0.0).astype(x.dtype)                  # (tm, H)

    # Fused transposed head matmul: (2*O, H) x (tm, H) -> (2*O, tm).
    # Batch lands on the lane axis => unmasked, lane-dense stores.
    logits = lax.dot_general(wh, h, dimension_numbers=dn,
                             preferred_element_type=jnp.float32)
    out_ref[...] = (1.0 / (1.0 + jnp.exp(-logits))).astype(out_ref.dtype)


def _round_up(a, b):
    return (a + b - 1) // b * b


def sensitive_classifier(x, w1, wr, ws, *, tm=2048):
    """race, sex = sigmoid(relu(x @ w1.T) @ {wr, ws}.T) — fused Pallas forward."""
    N, D_in = x.shape
    H, D_in_w = w1.shape
    O, H_r = wr.shape
    assert D_in_w == D_in and H_r == H and ws.shape == (O, H)

    # Stack the two heads once in the wrapper (tiny): one stationary weight,
    # one second-layer matmul, one output stream.
    w_heads = jnp.concatenate([wr, ws], axis=0)              # (2*O, H)

    # Tile selection:
    #  * small batch  -> single full-array block (block dims == array dims is
    #    always legal, no padding needed),
    #  * large batch  -> tiles that are multiples of 128 (legal lane-dense output
    #    blocks, unmasked stores) capped at ~N/2 so the grid has >= 2 steps and
    #    both v7x TensorCores get work.
    if N <= 256:
        tm_eff = N
    else:
        tm_eff = min(_round_up(tm, 128), _round_up(pl.cdiv(N, 2), 128))
    grid = (pl.cdiv(N, tm_eff),)

    out_dtype = x.dtype
    itemsize = jnp.dtype(out_dtype).itemsize
    cost = pl.CostEstimate(
        flops=2 * N * (D_in * H + H * 2 * O),
        transcendentals=N * 2 * O,
        bytes_accessed=itemsize * (N * D_in + H * D_in + 2 * O * H + 2 * O * N),
    )

    out_t = pl.pallas_call(
        sensitive_classifier_kernel,
        out_shape=jax.ShapeDtypeStruct((2 * O, N), out_dtype),
        grid_spec=pltpu.PrefetchScalarGridSpec(
            num_scalar_prefetch=0,
            grid=grid,
            in_specs=[
                # Batch tile marches along the grid (partial last block handled
                # by Pallas: OOB reads only feed OOB output columns, whose
                # stores are dropped).
                pl.BlockSpec((tm_eff, D_in), lambda i: (i, 0)),
                # Stationary weights: constant block index => DMA'd once,
                # reused for every batch tile.
                pl.BlockSpec((H, D_in), lambda i: (0, 0)),
                pl.BlockSpec((2 * O, H), lambda i: (0, 0)),
            ],
            # Transposed, lane-dense output: batch on the lane axis.
            out_specs=pl.BlockSpec((2 * O, tm_eff), lambda i: (0, i)),
        ),
        compiler_params=pltpu.CompilerParams(
            # Batch tiles are independent: shard across both TensorCores on v7x;
            # harmless on single-TC v5e/v6e.
            dimension_semantics=("parallel",),
        ),
        cost_estimate=cost,
    )(x, w1, w_heads)

    out = out_t.T                                            # (N, 2*O), tiny
    return out[:, :O], out[:, O:]


if __name__ == "__main__":
    # Small shapes consistent with the module: batch=8, input_size=32,
    # hidden=20 (fixed by the module), output_size=2.
    N, D_IN, HID, OUT = 8, 32, 20, 2
    key = jax.random.PRNGKey(0)
    kx, k1, kr, ks = jax.random.split(key, 4)
    x = jax.random.normal(kx, (N, D_IN), dtype=jnp.float32)
    # PyTorch (out_features, in_features) weight layouts, no biases.
    w1 = jax.random.normal(k1, (HID, D_IN), dtype=jnp.float32) * 0.1
    wr = jax.random.normal(kr, (OUT, HID), dtype=jnp.float32) * 0.1
    ws = jax.random.normal(ks, (OUT, HID), dtype=jnp.float32) * 0.1

    race, sex = sensitive_classifier(x, w1, wr, ws)
    race, sex = jax.block_until_ready((race, sex))

    # Reference: exactly the PyTorch forward chain.
    h_ref = jnp.maximum(x @ w1.T, 0.0)
    race_ref = jax.nn.sigmoid(h_ref @ wr.T)
    sex_ref = jax.nn.sigmoid(h_ref @ ws.T)
    assert race.shape == (N, OUT) and sex.shape == (N, OUT)
    assert jnp.allclose(race, race_ref, atol=1e-5), "race mismatch vs reference"
    assert jnp.allclose(sex, sex_ref, atol=1e-5), "sex mismatch vs reference"

    print("KERNEL_OK")
</pallas_src>

<mosaic_0001>
module attributes {stable_mosaic.version = 11 : i64} {
  func.func @sensitive_classifier_kernel(%arg0: i32, %arg1: memref<8x32xf32, #tpu.memory_space<vmem>>, %arg2: memref<20x32xf32, #tpu.memory_space<vmem>>, %arg3: memref<4x20xf32, #tpu.memory_space<vmem>>, %arg4: memref<4x8xf32, #tpu.memory_space<vmem>>) attributes {dimension_semantics = [#tpu.dimension_semantics<parallel>], iteration_bounds = array<i64: 1>, scalar_prefetch = 0 : i64, scratch_operands = 0 : i64, tpu.core_type = #tpu.core_type<tc>, window_params = [{transform_indices = @transform_0, window_bounds = array<i64: 8, 32>}, {pipeline_mode = #tpu.pipeline_mode<synchronous>, transform_indices = @transform_1, window_bounds = array<i64: 20, 32>}, {pipeline_mode = #tpu.pipeline_mode<synchronous>, transform_indices = @transform_2, window_bounds = array<i64: 4, 20>}, {transform_indices = @transform_3, window_bounds = array<i64: 4, 8>}]} {
    %c0 = arith.constant 0 : index
    %c0_0 = arith.constant 0 : index
    %0 = vector.load %arg1[%c0, %c0_0] : memref<8x32xf32, #tpu.memory_space<vmem>>, vector<8x32xf32>
    %c0_1 = arith.constant 0 : index
    %c0_2 = arith.constant 0 : index
    %1 = vector.load %arg2[%c0_1, %c0_2] : memref<20x32xf32, #tpu.memory_space<vmem>>, vector<20x32xf32>
    %c0_3 = arith.constant 0 : index
    %c0_4 = arith.constant 0 : index
    %2 = vector.load %arg3[%c0_3, %c0_4] : memref<4x20xf32, #tpu.memory_space<vmem>>, vector<4x20xf32>
    %cst = arith.constant dense<0.000000e+00> : vector<8x20xf32>
    %3 = tpu.matmul %0, %1, %cst {dimension_numbers = #tpu.dot_dimension_numbers<[1], [1], [0], [0], [0, 0, 1, 0], [], []>} : vector<8x32xf32>, vector<20x32xf32>, vector<8x20xf32> -> vector<8x20xf32>
    %cst_5 = arith.constant 0.000000e+00 : f32
    %4 = vector.broadcast %cst_5 : f32 to vector<8x20xf32>
    %5 = arith.maximumf %3, %4 : vector<8x20xf32>
    %cst_6 = arith.constant dense<0.000000e+00> : vector<4x8xf32>
    %6 = tpu.matmul %2, %5, %cst_6 {dimension_numbers = #tpu.dot_dimension_numbers<[1], [1], [0], [0], [0, 0, 1, 0], [], []>} : vector<4x20xf32>, vector<8x20xf32>, vector<4x8xf32> -> vector<4x8xf32>
    %cst_7 = arith.constant 0.000000e+00 : f32
    %7 = vector.broadcast %cst_7 : f32 to vector<4x8xf32>
    %8 = arith.subf %7, %6 : vector<4x8xf32>
    %9 = math.exp %8 : vector<4x8xf32>
    %cst_8 = arith.constant 1.000000e+00 : f32
    %10 = vector.broadcast %cst_8 : f32 to vector<4x8xf32>
    %11 = arith.addf %10, %9 : vector<4x8xf32>
    %cst_9 = arith.constant 1.000000e+00 : f32
    %12 = vector.broadcast %cst_9 : f32 to vector<4x8xf32>
    %13 = arith.divf %12, %11 : vector<4x8xf32>
    %c0_10 = arith.constant 0 : index
    %c0_11 = arith.constant 0 : index
    %14 = vector.load %arg4[%c0_10, %c0_11] : memref<4x8xf32, #tpu.memory_space<vmem>>, vector<4x8xf32>
    tpu.vector_store %arg4[%c0_10, %c0_11], %13 {strides = array<i32>} : memref<4x8xf32, #tpu.memory_space<vmem>>, vector<4x8xf32>,
    return
  }
  func.func @transform_0(%arg0: i32) -> (i32, i32) {
    %c0_i32 = arith.constant 0 : i32
    %c0_i32_0 = arith.constant 0 : i32
    return %arg0, %c0_i32 : i32, i32
  }
  func.func @transform_1(%arg0: i32) -> (i32, i32) {
    %c0_i32 = arith.constant 0 : i32
    %c0_i32_0 = arith.constant 0 : i32
    %c0_i32_1 = arith.constant 0 : i32
    return %c0_i32, %c0_i32_0 : i32, i32
  }
  func.func @transform_2(%arg0: i32) -> (i32, i32) {
    %c0_i32 = arith.constant 0 : i32
    %c0_i32_0 = arith.constant 0 : i32
    %c0_i32_1 = arith.constant 0 : i32
    return %c0_i32, %c0_i32_0 : i32, i32
  }
  func.func @transform_3(%arg0: i32) -> (i32, i32) {
    %c0_i32 = arith.constant 0 : i32
    %c0_i32_0 = arith.constant 0 : i32
    return %c0_i32, %arg0 : i32, i32
  }
}

</mosaic_0001>

<bundles_post_ra>
// kernel: tpu_custom_call.1
= control target key start
LH: loop header
LB: loop body
LE: loop exit
PB: predicated region body
PF: predicated region fallthrough
CT: control target
= control target key end

     0   :  { %8 = vsyncpa [#allocation3], 0  ;;  %s319_s0 = inlined_call_operand.hbm [shape: f32[8,32], index: 0, kind: input, shape index: {}]   ;;  %s320_s1 = inlined_call_operand.hbm [shape: f32[20,32], index: 1, kind: input, shape index: {}]   ;;  %s321_s2 = inlined_call_operand.hbm [shape: f32[4,20], index: 2, kind: input, shape index: {}]   ;;  %s322_s3 = inlined_call_operand.hbm [shape: f32[4,8], index: 3, kind: output, shape index: {}]  }
   0x1   :  { %9 = vsyncpa [#allocation6], 0  ;;  %s26_s14 = sshll.u32 %s320_s1, 4  ;;  %s27_s14 = int_to_ptr.hbm [resolvable:$true] %s26_s14 }
   0x2   :  { %10 = vsyncpa [#allocation4], 0  ;;  %s281_s15 = smov [#allocation5]   ;;  %s16_s19 = sshll.u32 %s319_s0, 4  ;;  %s17_s19 = int_to_ptr.hbm [resolvable:$true] %s16_s19 }
   0x3   :  { %s28_s16 = sshll.u32 %s281_s15, 4  ;;  %s282_s20 = smov 128   ;;  %s29_s16 = int_to_ptr.vmem [resolvable:$true] %s28_s16 }
   0x4   :  { %s283_s21 = smov 8   ;;  %s284_s22 = smov [#allocation2]  }
   0x5   :  { %34 = dma.hbm_to_vmem [thread:$0]  %s27_s14, 384, %s29_s16, [#allocation6], %s282_s20, %s282_s20, %s283_s21  }
   0x6   :  { %s18_s23 = sshll.u32 %s284_s22, 4  ;;  %s40_s26 = sshll.u32 %s321_s2, 4  ;;  %s19_s23 = int_to_ptr.vmem [resolvable:$true] %s18_s23  ;;  %s41_s26 = int_to_ptr.hbm [resolvable:$true] %s40_s26 }
   0x7   :  { %21 = dma.hbm_to_vmem [thread:$0]  %s17_s19, 128, %s19_s23, [#allocation3]  }
   0x8   :  { %s285_s1 = smov [#allocation7]  }
   0x9   :  { %s42_s27 = sshll.u32 %s285_s1, 4  ;;  %s43_s27 = int_to_ptr.vmem [resolvable:$true] %s42_s27 }
   0xa   :  { %45 = dma.hbm_to_vmem [thread:$0]  %s41_s26, 64, %s43_s27, [#allocation6]  }
   0xb   :  { %275 = dma.done.wait [#allocation3], 128  }
   0xc   :  { %276 = vsyncadd [#allocation3], 4294967168 }
   0xd   :  { %277 = dma.done.wait [#allocation6], 448  }
   0xe   :  { %278 = vsyncadd [#allocation6], 4294966848  ;;  %vm63_vm0 = vcmask 261120   ;;  %v61_v0 = vld [vmem:[#allocation5 + $0x10] sm:$0xf]  ;;  %v60_v1 = vld [vmem:[#allocation5 + $0x8] sm:$0xff] }
   0xf   :  { %163 = vmatpush.xpose.msk.msra.mxu0 %vm63_vm0, %v61_v0  ;;  %v59_v2 = vld [vmem:[#allocation5] sm:$0xff]  ;;  %v58_v3 = vld [vmem:[#allocation2] sm:$0xff]  ;;  %vm97_vm1 = vcmask 162816   ;;  %s286_s0 = smov [#allocation8]   ;;  %s152_s30 = sshll.u32 %s322_s3, 4  ;;  %vm143_vm5 = vcmask 60416   ;;  %s153_s30 = int_to_ptr.hbm [resolvable:$true] %s152_s30 }
  0x10   :  { %v62_v6 = vld [vmem:[#allocation7] sm:$0xf]  ;;  %s150_s2 = sshll.u32 %s286_s0, 4  ;;  %s151_s2 = int_to_ptr.vmem [resolvable:$true] %s150_s2 }
  0x13   :  { %164 = vmatpush.xpose.msk.msra.mxu0 %vm63_vm0, %v60_v1 }
  0x17   :  { %165 = vmatpush.xpose.msk.msra.mxu0 %vm63_vm0, %v59_v2 }
  0x1a   :  { %166 = vmatmul.msk.f32.vlgmr.msra.gmra.mxu0 %vm63_vm0, %v58_v3 }
  0x97   :  { %v93_v4 = vpop.f32.mrf.mxu0 }
  0x98   :  { %v96_v5 = vmax.f32 %v93_v4, 0.0 }
  0x9a   :  { %167 = vmatpush.xpose.msk.msra.mxu1 %vm97_vm1, %v96_v5 }
  0x9d   :  { %168 = vmatmul.msk.f32.vlgmr.msra.gmra.mxu1 %vm97_vm1, %v62_v6 }
 0x11a   :  { %v121_v7 = vpop.f32.mrf.mxu1 }
 0x11b   :  { %v124_v8 = vsub.f32 0.0, %v121_v7 }
 0x11d   :  { %v125_v9 = vmul.f32 1.442695, %v124_v8 }
 0x11f   :  { %175 = vpow2.f32 %v125_v9 }
 0x125   :  { %v176_v10 = vpop.eup %175 }
 0x126   :  { %v127_v11 = vadd.f32 1.0, %v176_v10 }
 0x128   :  { %177 = vrcp.f32 %v127_v11  ;;  %v139_v15 = vand.u32 2147483648, %v127_v11  ;;  %v137_v17 = vand.u32 2147483647, %v127_v11  ;;  %vm133_vm3 = vweird.f32 %v127_v11 }
 0x12a   :  { %v140_v19 = vor.u32 1.1754944e-38, %v139_v15  ;;  %vm138_vm6 = vcmp.eq.f32.partialorder %v137_v17, 8.507059e+37 }
 0x12e   :  { %v178_v12 = vpop.eup %177 }
 0x12f   :  { %v129_v13 = vmul.f32 %v178_v12, %v127_v11  ;;  %vm134_vm2 = vweird.f32 %v178_v12 }
 0x130   :  { %vm135_vm4 = vmor %vm133_vm3, %vm134_vm2 }
 0x131   :  { %v130_v14 = vsub.f32 1.0, %v129_v13 }
 0x133   :  { %v131_v16 = vmul.f32 %v178_v12, %v130_v14 }
 0x135   :  { %v132_v18 = vadd.f32 %v178_v12, %v131_v16 }
 0x137   :  { %v136_v20 = vsel %vm135_vm4, %v178_v12, %v132_v18 }
 0x138   :  { %v141_v21 = vsel %vm138_vm6, %v140_v19, %v136_v20 }
 0x139   :  { %144 = vst.msk [vmem:[#allocation8] sm:$0xf] %vm143_vm5, %v141_v21 }
 0x13a   :  { %155 = dma.vmem_to_hbm [thread:$0]  %s151_s2, 64, %s153_s30, [#allocation4]  }
 0x13b   :  { %279 = dma.done.wait [#allocation4], 64  }
 0x13c   :  { %280 = vsyncadd [#allocation4], 4294967232 }
 0x13d   :  { %160 = vsyncpa [#allocation3], 1 }
 0x13e   :  { %161 = vsyncpa [#allocation6], 1 }
 0x13f   :  { %162 = vsyncpa [#allocation4], 1 }

</bundles_post_ra>
